<compile_context>
chip_gen: v7x
topology: tpu7x:2x2x1
jax: 0.10.0
libtpu: 0.0.40
codegen_flags: <defaults>
</compile_context>

<pallas_src>
import jax
import jax.numpy as jnp
from jax.experimental import pallas as pl
from jax.experimental.pallas import tpu as pltpu

EPS = 1e-6

_TARGET_BLOCK_BYTES = 4 << 20   # ~4 MiB of input per tile: 85%+ HBM roofline


def _vmem_limit_bytes() -> int:
    """Generation-aware scoped-VMEM limit (~50% of physical, capped at 64 MiB)."""
    try:
        cap = int(pltpu.get_tpu_info().vmem_capacity_bytes)
    except Exception:  # pragma: no cover - interpret mode / query unavailable
        cap = 64 << 20
    # v5e/v6e: 128 MiB physical -> 64 MiB limit; v7x: 64 MiB physical -> 32 MiB.
    return int(max(16 << 20, min(cap // 2, 64 << 20)))


def _choose_tile_rows(n_rows: int, d: int, itemsize: int, vmem_limit: int) -> int:
    """Row-tile size.

    Targets ~4 MiB of input bytes per block while keeping all in-flight
    VMEM -- 2x double-buffered input + 2x double-buffered output (at input
    dtype) plus ~3 f32 full-tile working temporaries inside the kernel --
    under half the scoped-VMEM limit (headroom for compiler scratch).
    """
    per_row_inflight = 4 * d * itemsize + 3 * d * 4   # pipeline bufs + f32 temps
    rows_by_vmem = (vmem_limit // 2) // max(per_row_inflight, 1)
    rows_by_block = _TARGET_BLOCK_BYTES // max(d * itemsize, 1)
    tile = max(8, min(rows_by_vmem, rows_by_block))
    tile = (tile // 8) * 8                             # sublane (8) alignment
    if n_rows <= tile:
        return n_rows                                  # full extent: always legal
    return tile


def _encoder_layernorm_kernel(alpha_ref, beta_ref, x_ref, o_ref):
    """Quirky LayerNorm over the last axis of a (tile_rows, d_model) tile.

    alpha_ref, beta_ref : SMEM scalars, shape (1,)
    x_ref, o_ref        : VMEM tiles, shape (tile_rows, d_model)
    """
    x = x_ref[...].astype(jnp.float32)
    d = x.shape[-1]

    # Two-pass mean / variance (same formulation as torch.std; avoids the
    # E[x^2] - E[x]^2 cancellation error flagged in review).
    mean = jnp.sum(x, axis=-1, keepdims=True) * jnp.float32(1.0 / d)
    diff = x - mean
    # torch.std default: unbiased (ddof=1).
    # TODO(synk): d_model == 1 divides by zero (ddof=1) -- not a transformer case.
    var = jnp.sum(diff * diff, axis=-1, keepdims=True) * jnp.float32(1.0 / (d - 1))
    std = jnp.sqrt(var)

    # Fold beta and the 1/sqrt(std + eps) into one per-row scalar; the
    # tile-wide normalize pass is then a single fused multiply-add reusing
    # `diff` (alpha is the additive shift since diff already has mean removed).
    scale = beta_ref[0] / jnp.sqrt(std + jnp.float32(EPS))
    o_ref[...] = (diff * scale + alpha_ref[0]).astype(o_ref.dtype)


def encoder_forward(x, src_mask, alpha, beta):
    """Encoder.forward.  x: (B, S, D); src_mask unused (no concrete sub-layers)."""
    del src_mask  # TODO(synk): consumed only by the opaque sub-layer ModuleList.
    b, s, d = x.shape
    n_rows = b * s
    x2d = x.reshape(n_rows, d)  # rows x d_model; reduction axis on lanes

    vmem_limit = _vmem_limit_bytes()
    tile_rows = _choose_tile_rows(n_rows, d, x2d.dtype.itemsize, vmem_limit)
    grid = (pl.cdiv(n_rows, tile_rows),)

    itemsize = x2d.dtype.itemsize
    cost = pl.CostEstimate(
        flops=8 * n_rows * d,             # sub, sq, 2 reduce-adds, mul, add, ...
        transcendentals=2 * n_rows,       # sqrt(var) + sqrt(std+eps) per row
        bytes_accessed=2 * n_rows * d * itemsize,
    )

    out2d = pl.pallas_call(
        _encoder_layernorm_kernel,
        out_shape=jax.ShapeDtypeStruct((n_rows, d), x.dtype),
        grid=grid,
        in_specs=[
            pl.BlockSpec(memory_space=pltpu.SMEM),            # alpha (1,)
            pl.BlockSpec(memory_space=pltpu.SMEM),            # beta  (1,)
            pl.BlockSpec((tile_rows, d), lambda i: (i, 0)),   # x tile
        ],
        out_specs=pl.BlockSpec((tile_rows, d), lambda i: (i, 0)),
        compiler_params=pltpu.CompilerParams(
            dimension_semantics=("parallel",),
            vmem_limit_bytes=vmem_limit,
        ),
        cost_estimate=cost,
    )(alpha, beta, x2d)

    return out2d.reshape(b, s, d)


def _reference(x, alpha, beta):
    mean = jnp.mean(x, axis=-1, keepdims=True)
    var = jnp.var(x, axis=-1, keepdims=True, ddof=1)
    std = jnp.sqrt(var)
    norm = (x - mean) / jnp.sqrt(std + EPS)
    return norm * beta[0] + alpha[0]


if __name__ == "__main__":
    key = jax.random.PRNGKey(0)
    kx, km = jax.random.split(key)

    B, S, D = 2, 8, 32
    x = jax.random.normal(kx, (B, S, D), dtype=jnp.float32)
    src_mask = (jax.random.uniform(km, (B, 1, 1, S)) > 0.1).astype(jnp.float32)

    # deterministic parameter init, matching nn.Parameter(zeros)/(ones)
    alpha = jnp.zeros((1,), dtype=jnp.float32)
    beta = jnp.ones((1,), dtype=jnp.float32)

    out = encoder_forward(x, src_mask, alpha, beta)
    out = jax.block_until_ready(out)

    ref = _reference(x, alpha, beta)
    assert out.shape == (B, S, D)
    assert jnp.allclose(out, ref, atol=1e-5, rtol=1e-5), "mismatch vs reference"

    print("KERNEL_OK")
</pallas_src>

<mosaic_0001>
module attributes {stable_mosaic.version = 11 : i64} {
  func.func @_encoder_layernorm_kernel(%arg0: i32, %arg1: memref<1xf32, #tpu.memory_space<smem>>, %arg2: memref<1xf32, #tpu.memory_space<smem>>, %arg3: memref<16x32xf32, #tpu.memory_space<vmem>>, %arg4: memref<16x32xf32, #tpu.memory_space<vmem>>) attributes {dimension_semantics = [#tpu.dimension_semantics<parallel>], iteration_bounds = array<i64: 1>, scalar_prefetch = 0 : i64, scratch_operands = 0 : i64, tpu.core_type = #tpu.core_type<tc>, window_params = [{transform_indices = @transform_0, window_bounds = array<i64: 1>}, {transform_indices = @transform_1, window_bounds = array<i64: 1>}, {transform_indices = @transform_2, window_bounds = array<i64: 16, 32>}, {transform_indices = @transform_3, window_bounds = array<i64: 16, 32>}]} {
    %c0 = arith.constant 0 : index
    %c0_0 = arith.constant 0 : index
    %0 = vector.load %arg3[%c0, %c0_0] : memref<16x32xf32, #tpu.memory_space<vmem>>, vector<16x32xf32>
    %cst = arith.constant dense<0.000000e+00> : vector<16xf32>
    %1 = vector.multi_reduction <add>, %0, %cst [1] : vector<16x32xf32> to vector<16xf32>
    %2 = vector.shape_cast %1 : vector<16xf32> to vector<16x1xf32>
    %cst_1 = arith.constant 3.125000e-02 : f32
    %3 = vector.broadcast %cst_1 : f32 to vector<16x1xf32>
    %4 = arith.mulf %2, %3 : vector<16x1xf32>
    %5 = vector.broadcast %4 : vector<16x1xf32> to vector<16x32xf32>
    %6 = arith.subf %0, %5 : vector<16x32xf32>
    %7 = arith.mulf %6, %6 : vector<16x32xf32>
    %cst_2 = arith.constant dense<0.000000e+00> : vector<16xf32>
    %8 = vector.multi_reduction <add>, %7, %cst_2 [1] : vector<16x32xf32> to vector<16xf32>
    %9 = vector.shape_cast %8 : vector<16xf32> to vector<16x1xf32>
    %cst_3 = arith.constant 0.0322580636 : f32
    %10 = vector.broadcast %cst_3 : f32 to vector<16x1xf32>
    %11 = arith.mulf %9, %10 : vector<16x1xf32>
    %12 = math.sqrt %11 : vector<16x1xf32>
    %c0_4 = arith.constant 0 : index
    %13 = memref.load %arg2[%c0_4] : memref<1xf32, #tpu.memory_space<smem>>
    %cst_5 = arith.constant 9.99999997E-7 : f32
    %14 = vector.broadcast %cst_5 : f32 to vector<16x1xf32>
    %15 = arith.addf %12, %14 : vector<16x1xf32>
    %16 = math.sqrt %15 : vector<16x1xf32>
    %17 = vector.broadcast %13 : f32 to vector<16x1xf32>
    %18 = arith.divf %17, %16 : vector<16x1xf32>
    %19 = vector.broadcast %18 : vector<16x1xf32> to vector<16x32xf32>
    %20 = arith.mulf %6, %19 : vector<16x32xf32>
    %c0_6 = arith.constant 0 : index
    %21 = memref.load %arg1[%c0_6] : memref<1xf32, #tpu.memory_space<smem>>
    %22 = vector.broadcast %21 : f32 to vector<16x32xf32>
    %23 = arith.addf %20, %22 : vector<16x32xf32>
    %c0_7 = arith.constant 0 : index
    %c0_8 = arith.constant 0 : index
    %24 = vector.load %arg4[%c0_7, %c0_8] : memref<16x32xf32, #tpu.memory_space<vmem>>, vector<16x32xf32>
    tpu.vector_store %arg4[%c0_7, %c0_8], %23 {strides = array<i32>} : memref<16x32xf32, #tpu.memory_space<vmem>>, vector<16x32xf32>,
    return
  }
  func.func @transform_0(%arg0: i32) -> i32 {
    %c0_i32 = arith.constant 0 : i32
    %c0_i32_0 = arith.constant 0 : i32
    return %c0_i32 : i32
  }
  func.func @transform_1(%arg0: i32) -> i32 {
    %c0_i32 = arith.constant 0 : i32
    %c0_i32_0 = arith.constant 0 : i32
    return %c0_i32 : i32
  }
  func.func @transform_2(%arg0: i32) -> (i32, i32) {
    %c0_i32 = arith.constant 0 : i32
    %c0_i32_0 = arith.constant 0 : i32
    return %arg0, %c0_i32 : i32, i32
  }
  func.func @transform_3(%arg0: i32) -> (i32, i32) {
    %c0_i32 = arith.constant 0 : i32
    %c0_i32_0 = arith.constant 0 : i32
    return %arg0, %c0_i32 : i32, i32
  }
}

</mosaic_0001>

<bundles_post_ra>
// kernel: tpu_custom_call.1
= control target key start
LH: loop header
LB: loop body
LE: loop exit
PB: predicated region body
PF: predicated region fallthrough
CT: control target
= control target key end

     0   :  { %10 = vsyncpa [#allocation5], 0  ;;  %s245_s0 = inlined_call_operand.<no memory space> [shape: f32[1], index: 0, kind: input, shape index: {}]   ;;  %s246_s1 = inlined_call_operand.<no memory space> [shape: f32[1], index: 1, kind: input, shape index: {}]   ;;  %s247_s2 = inlined_call_operand.hbm [shape: f32[16,32], index: 2, kind: input, shape index: {}]   ;;  %s248_s3 = inlined_call_operand.hbm [shape: f32[16,32], index: 3, kind: output, shape index: {}]  }
   0x1   :  { %11 = vsyncpa [#allocation6], 0  ;;  %s179_s12 = smov [#allocation4]   ;;  %s131_s16 = scalar_lea.hbm %s247_s2, 256 }
   0x2   :  { %s21_s13 = sshll.u32 %s179_s12, 4  ;;  %p132_p0 = scmp.ne.s32.totalorder %s247_s2, %s131_s16  ;;  %s22_s13 = int_to_ptr.vmem [resolvable:$true] %s21_s13 }
   0x3   :  { %p135_p1 = scmp.lt.u32.totalorder %s131_s16, %s247_s2 }
   0x5   :  { %p137_p2 = pnand %p135_p1, %p132_p0 }
   0x7   :  { %140 = shalt.err (!%p137_p2)
}
   0x8   :  { %s141_s21 = scalar_lea.vmem %s22_s13, 256  ;;  %p146_p4 = scmp.lt.s32.totalorder %s22_s13, %s22_s13 }
   0x9   :  { %p142_p3 = scmp.ne.s32.totalorder %s22_s13, %s141_s21  ;;  %p147_p5 = scmp.lt.s32.totalorder %s141_s21, %s141_s21 }
   0xb   :  { %p148_p6 = por %p147_p5, %p146_p4 }
   0xd   :  { %p149_p7 = pnand %p148_p6, %p142_p3 }
   0xf   :  { %152 = shalt.err (!%p149_p7)
}
  0x10   :  { %s180_s22 = smov 128   ;;  %s181_s23 = smov 8  }
  0x11   :  { %27 = dma.hbm_to_vmem [thread:$0]  %s247_s2, 256, %s22_s13, [#allocation5], %s180_s22, %s180_s22, %s181_s23  }
  0x12   :  { %175 = dma.done.wait [#allocation5], 256  }
  0x13   :  { %176 = vsyncadd [#allocation5], 4294967040  ;;  %vm33_vm0 = vcmask 261120   ;;  %v31_v0 = vld [vmem:[#allocation4] sm:$0xff]  ;;  %v32_v1 = vld [vmem:[#allocation4 + $0x8] sm:$0xff]  ;;  %v85_v40 = vstv %s246_s1  ;;  %v93_v43 = vstv %s245_s0  ;;  %s182_s29 = smov [#allocation7]  }
  0x14   :  { %v34_v2 = vsel %vm33_vm0, %v31_v0, 0.0  ;;  %v37_v3 = vsel %vm33_vm0, %v32_v1, 0.0  ;;  %s103_s30 = sshll.u32 %s182_s29, 4  ;;  %s104_s30 = int_to_ptr.vmem [resolvable:$true] %s103_s30 }
  0x15   :  { %35 = vadd.xlane.f32.xlu0 %v34_v2  ;;  %s153_s1 = scalar_lea.vmem %s104_s30, 256  ;;  %p158_p9 = scmp.lt.s32.totalorder %s104_s30, %s104_s30 }
  0x16   :  { %p154_p8 = scmp.ne.s32.totalorder %s104_s30, %s153_s1  ;;  %p159_p10 = scmp.lt.s32.totalorder %s153_s1, %s153_s1 }
  0x18   :  { %p160_p11 = por %p159_p10, %p158_p9 }
  0x19   :  { %38 = vadd.xlane.f32.xlu0 %v37_v3 }
  0x1a   :  { %p161_p12 = pnand %p160_p11, %p154_p8 }
  0xa2   :  { %v36_v4 = vpop.xlane.xlu0 %35 }
  0xa3   :  { %v40_v5 = vmul.f32 0.03125, %v36_v4 }
  0xa5   :  { %v42_v6 = vsub.f32 %v31_v0, %v40_v5 }
  0xa6   :  { %v39_v7 = vpop.xlane.xlu0 %38 }
  0xa7   :  { %v41_v8 = vmul.f32 0.03125, %v39_v7  ;;  %v44_v9 = vmul.f32 %v42_v6, %v42_v6 }
  0xa9   :  { %v43_v10 = vsub.f32 %v32_v1, %v41_v8  ;;  %v46_v11 = vsel %vm33_vm0, %v44_v9, 0.0 }
  0xaa   :  { %47 = vadd.xlane.f32.xlu1 %v46_v11 }
  0xab   :  { %v45_v12 = vmul.f32 %v43_v10, %v43_v10 }
  0xad   :  { %v49_v13 = vsel %vm33_vm0, %v45_v12, 0.0 }
  0xae   :  { %50 = vadd.xlane.f32.xlu1 %v49_v13 }
 0x137   :  { %v48_v14 = vpop.xlane.xlu1 %47 }
 0x138   :  { %v52_v15 = vmul.f32 0.032258064, %v48_v14 }
 0x13a   :  { %119 = vrsqrt.f32 %v52_v15  ;;  %vm56_vm1 = vcmp.eq.f32.partialorder %v52_v15, inf  ;;  %v59_v20 = vand.u32 2147483648, %v52_v15  ;;  %vm58_vm2 = vcmp.eq.f32.partialorder %v52_v15, 0.0 }
 0x13b   :  { %v51_v16 = vpop.xlane.xlu1 %50 }
 0x13c   :  { %v53_v17 = vmul.f32 0.032258064, %v51_v16 }
 0x13e   :  { %121 = vrsqrt.f32 %v53_v17  ;;  %vm63_vm3 = vcmp.eq.f32.partialorder %v53_v17, inf  ;;  %v66_v26 = vand.u32 2147483648, %v53_v17  ;;  %vm65_vm4 = vcmp.eq.f32.partialorder %v53_v17, 0.0 }
 0x144   :  { %v120_v18 = vpop.eup %119 }
 0x145   :  { %v55_v19 = vmul.f32 %v120_v18, %v52_v15 }
 0x147   :  { %v57_v21 = vsel %vm56_vm1, %v52_v15, %v55_v19 }
 0x148   :  { %v122_v22 = vpop.eup %121  ;;  %v60_v23 = vsel %vm58_vm2, %v59_v20, %v57_v21 }
 0x149   :  { %v69_v24 = vadd.f32 1e-06, %v60_v23  ;;  %v62_v25 = vmul.f32 %v122_v22, %v53_v17 }
 0x14b   :  { %123 = vrsqrt.f32 %v69_v24  ;;  %v64_v27 = vsel %vm63_vm3, %v53_v17, %v62_v25  ;;  %vm73_vm5 = vcmp.eq.f32.partialorder %v69_v24, inf  ;;  %v76_v32 = vand.u32 2147483648, %v69_v24 }
 0x14c   :  { %v67_v28 = vsel %vm65_vm4, %v66_v26, %v64_v27  ;;  %vm75_vm6 = vcmp.eq.f32.partialorder %v69_v24, 0.0 }
 0x14d   :  { %v70_v29 = vadd.f32 1e-06, %v67_v28 }
 0x14f   :  { %125 = vrsqrt.f32 %v70_v29  ;;  %vm80_vm7 = vcmp.eq.f32.partialorder %v70_v29, inf  ;;  %v83_v37 = vand.u32 2147483648, %v70_v29  ;;  %vm82_vm8 = vcmp.eq.f32.partialorder %v70_v29, 0.0 }
 0x155   :  { %v124_v30 = vpop.eup %123 }
 0x156   :  { %v72_v31 = vmul.f32 %v124_v30, %v69_v24 }
 0x158   :  { %v74_v33 = vsel %vm73_vm5, %v69_v24, %v72_v31 }
 0x159   :  { %v126_v34 = vpop.eup %125  ;;  %v77_v35 = vsel %vm75_vm6, %v76_v32, %v74_v33 }
 0x15a   :  { %v79_v36 = vmul.f32 %v126_v34, %v70_v29  ;;  %127 = vrcp.f32 %v77_v35 }
 0x15c   :  { %v81_v38 = vsel %vm80_vm7, %v70_v29, %v79_v36 }
 0x15d   :  { %v84_v39 = vsel %vm82_vm8, %v83_v37, %v81_v38 }
 0x15e   :  { %129 = vrcp.f32 %v84_v39 }
 0x164   :  { %v128_v41 = vpop.eup %127 }
 0x165   :  { %v87_v42 = vmul.f32 %v128_v41, %v85_v40 }
 0x167   :  { %v90_v44 = vmul.f32 %v87_v42, %v42_v6 }
 0x168   :  { %v130_v45 = vpop.eup %129 }
 0x169   :  { %v89_v46 = vmul.f32 %v130_v45, %v85_v40  ;;  %v94_v47 = vadd.f32 %v93_v43, %v90_v44 }
 0x16b   :  { %v91_v48 = vmul.f32 %v89_v46, %v43_v10  ;;  %96 = vst.msk [vmem:[#allocation7] sm:$0xff] %vm33_vm0, %v94_v47 }
 0x16d   :  { %v95_v49 = vadd.f32 %v93_v43, %v91_v48 }
 0x16f   :  { %97 = vst.msk [vmem:[#allocation7 + $0x8] sm:$0xff] %vm33_vm0, %v95_v49 }
 0x170   :  { %164 = shalt.err (!%p161_p12)
}
 0x171   :  { %s165_s5 = scalar_lea.hbm %s248_s3, 256 }
 0x172   :  { %p166_p13 = scmp.ne.s32.totalorder %s248_s3, %s165_s5  ;;  %p169_p0 = scmp.lt.u32.totalorder %s165_s5, %s248_s3 }
 0x174   :  { %p171_p1 = pnand %p169_p0, %p166_p13 }
 0x176   :  { %174 = shalt.err (!%p171_p1)
}
 0x177   :  { %109 = dma.vmem_to_hbm [thread:$0]  %s104_s30, 256, %s248_s3, [#allocation6], %s180_s22, %s180_s22, %s181_s23  }
 0x178   :  { %177 = dma.done.wait [#allocation6], 256  }
 0x179   :  { %178 = vsyncadd [#allocation6], 4294967040 }
 0x17a   :  { %113 = vsyncpa [#allocation5], 1 }
 0x17b   :  { %114 = vsyncpa [#allocation6], 1 }

</bundles_post_ra>
